<compile_context>
chip_gen: v7x
topology: tpu7x:2x2x1
jax: 0.10.0
libtpu: 0.0.40
codegen_flags: <defaults>
</compile_context>

<pallas_src>
import functools
import math

import jax
import jax.numpy as jnp
from jax.experimental import pallas as pl
from jax.experimental.pallas import tpu as pltpu


# ----------------------------------------------------------------------------
# helpers
# ----------------------------------------------------------------------------
def _round_up(x, m):
    return ((x + m - 1) // m) * m


def _pick_tile(dim, cap, gran):
    """Largest multiple of `gran` <= cap that divides `dim` (dim % gran == 0)."""
    t = min(dim, (cap // gran) * gran)
    while dim % t:
        t -= gran
    return t


def _pad2d(a, rows, cols):
    r, c = a.shape
    if r == rows and c == cols:
        return a
    return jnp.pad(a, ((0, rows - r), (0, cols - c)))


_VMEM_LIMIT = 32 * 1024 * 1024   # > v5e's 16 MiB default, safe on v6e/v7x


def _mosaic_params(sem):
    return pltpu.CompilerParams(dimension_semantics=sem,
                                vmem_limit_bytes=_VMEM_LIMIT)


# ----------------------------------------------------------------------------
# generic tiled linear:  y = (relu?)(x @ w + b)   (padded, bf16 operands)
# ----------------------------------------------------------------------------
def _linear_kernel(x_ref, w_ref, b_ref, o_ref, acc_ref, *, relu):
    k = pl.program_id(2)                 # bound at top level (interpret-safe)
    nk = pl.num_programs(2)

    @pl.when(k == 0)
    def _init():
        acc_ref[...] = jnp.zeros_like(acc_ref)

    acc_ref[...] += jnp.dot(x_ref[...], w_ref[...],
                            preferred_element_type=jnp.float32)

    @pl.when(k == nk - 1)
    def _fin():
        y = acc_ref[...] + b_ref[...]
        if relu:
            y = jnp.maximum(y, 0.0)
        o_ref[...] = y.astype(o_ref.dtype)


def padded_linear(xp, wp, bp, *, relu=False, out_dtype=jnp.bfloat16):
    """xp:(Mp,Kp) bf16, wp:(Kp,Np) bf16, bp:(1,Np) f32 -> (Mp,Np) out_dtype."""
    Mp, Kp = xp.shape
    Kw, Np = wp.shape
    assert Kp == Kw and bp.shape == (1, Np)
    tm = _pick_tile(Mp, 256, 16)          # multiples of 16 for bf16 LHS
    tk = _pick_tile(Kp, 1024, 128)
    tn = _pick_tile(Np, 512, 128)
    grid = (Mp // tm, Np // tn, Kp // tk)
    # TODO(synk): sweep pl.Buffered(3) on the weight spec for small-M layers.
    return pl.pallas_call(
        functools.partial(_linear_kernel, relu=relu),
        out_shape=jax.ShapeDtypeStruct((Mp, Np), out_dtype),
        grid=grid,
        in_specs=[
            pl.BlockSpec((tm, tk), lambda i, j, k: (i, k)),
            pl.BlockSpec((tk, tn), lambda i, j, k: (k, j)),
            pl.BlockSpec((1, tn), lambda i, j, k: (0, j)),
        ],
        out_specs=pl.BlockSpec((tm, tn), lambda i, j, k: (i, j)),
        scratch_shapes=[pltpu.VMEM((tm, tn), jnp.float32)],
        compiler_params=_mosaic_params(("parallel", "parallel", "arbitrary")),
    )(xp, wp, bp)


# ----------------------------------------------------------------------------
# fused emd|var linear: per-COLUMN relu mask (1 -> ReLU, 0 -> identity).
# BN eval scale was folded into the var weights/bias at init.
# ----------------------------------------------------------------------------
def _masked_relu_linear_kernel(x_ref, w_ref, b_ref, m_ref, o_ref, acc_ref):
    k = pl.program_id(2)
    nk = pl.num_programs(2)

    @pl.when(k == 0)
    def _init():
        acc_ref[...] = jnp.zeros_like(acc_ref)

    acc_ref[...] += jnp.dot(x_ref[...], w_ref[...],
                            preferred_element_type=jnp.float32)

    @pl.when(k == nk - 1)
    def _fin():
        y = acc_ref[...] + b_ref[...]
        y = jnp.where(m_ref[...] > 0.5, jnp.maximum(y, 0.0), y)
        o_ref[...] = y.astype(o_ref.dtype)


def padded_linear_masked_relu(xp, wp, bp, maskp, *, out_dtype=jnp.float32):
    Mp, Kp = xp.shape
    Kw, Np = wp.shape
    assert Kp == Kw and bp.shape == (1, Np) and maskp.shape == (1, Np)
    tm = _pick_tile(Mp, 256, 16)
    tk = _pick_tile(Kp, 1024, 128)
    tn = _pick_tile(Np, 512, 128)
    grid = (Mp // tm, Np // tn, Kp // tk)
    return pl.pallas_call(
        _masked_relu_linear_kernel,
        out_shape=jax.ShapeDtypeStruct((Mp, Np), out_dtype),
        grid=grid,
        in_specs=[
            pl.BlockSpec((tm, tk), lambda i, j, k: (i, k)),
            pl.BlockSpec((tk, tn), lambda i, j, k: (k, j)),
            pl.BlockSpec((1, tn), lambda i, j, k: (0, j)),
            pl.BlockSpec((1, tn), lambda i, j, k: (0, j)),
        ],
        out_specs=pl.BlockSpec((tm, tn), lambda i, j, k: (i, j)),
        scratch_shapes=[pltpu.VMEM((tm, tn), jnp.float32)],
        compiler_params=_mosaic_params(("parallel", "parallel", "arbitrary")),
    )(xp, wp, bp, maskp)


# ----------------------------------------------------------------------------
# fused stochastic head: logit[t, b] = (emb[b] + std[b]*noise[b,t]) @ W + bias
# T is collapsed into the matmul M dim; emb/std broadcast from one VMEM row.
# Output written directly in (T, B*O) layout -> no XLA transpose afterwards.
# ----------------------------------------------------------------------------
def _sto_final_kernel(emb_ref, std_ref, noise_ref, w_ref, b_ref, o_ref, acc_ref):
    k = pl.program_id(3)
    nk = pl.num_programs(3)

    @pl.when(k == 0)
    def _init():
        acc_ref[...] = jnp.zeros_like(acc_ref)

    sto = emb_ref[...] + std_ref[...] * noise_ref[...].astype(jnp.float32)
    acc_ref[...] += jnp.dot(sto.astype(jnp.bfloat16), w_ref[...],
                            preferred_element_type=jnp.float32)

    @pl.when(k == nk - 1)
    def _fin():
        o_ref[...] = (acc_ref[...] + b_ref[...]).astype(o_ref.dtype)


def sto_final_pallas(emb_p, std_p, noise, wp, bp, *, max_t, num_out):
    """emb_p/std_p:(B,1,Kp) f32, noise:(B,Tp,Kp) bf16, wp:(Kp,Np) bf16."""
    B, _, Kp = emb_p.shape
    _, Tp, Kn = noise.shape
    Kw, Np = wp.shape
    assert Kp == Kn == Kw
    tt = _pick_tile(Tp, 128, 16)
    tk = _pick_tile(Kp, 1024, 128)
    tn = _pick_tile(Np, 512, 128)
    njb = Np // tn
    grid = (B, Tp // tt, njb, Kp // tk)
    out = pl.pallas_call(
        _sto_final_kernel,
        out_shape=jax.ShapeDtypeStruct((Tp, B * Np), jnp.float32),
        grid=grid,
        in_specs=[
            pl.BlockSpec((None, 1, tk), lambda bb, it, j, k: (bb, 0, k)),
            pl.BlockSpec((None, 1, tk), lambda bb, it, j, k: (bb, 0, k)),
            pl.BlockSpec((None, tt, tk), lambda bb, it, j, k: (bb, it, k)),
            pl.BlockSpec((tk, tn), lambda bb, it, j, k: (k, j)),
            pl.BlockSpec((1, tn), lambda bb, it, j, k: (0, j)),
        ],
        out_specs=pl.BlockSpec((tt, tn),
                               lambda bb, it, j, k: (it, bb * njb + j)),
        scratch_shapes=[pltpu.VMEM((tt, tn), jnp.float32)],
        compiler_params=_mosaic_params(
            ("parallel", "parallel", "parallel", "arbitrary")),
    )(emb_p, std_p, noise, wp, bp)
    return out.reshape(Tp, B, Np)[:max_t, :, :num_out]


# ----------------------------------------------------------------------------
# Parameter init (matches VGG._initialize_weights) + one-time padded bf16 prep
# ----------------------------------------------------------------------------
def init_params(key, *, c_in, c_feat, h, w, hidden, num_out):
    h2, w2 = h // 2, w // 2
    flat = c_feat * h2 * w2
    ks = jax.random.split(key, 5)

    # Conv2d: normal(0, sqrt(2 / (kh*kw*out_channels))), bias = 0
    conv_w = jax.random.normal(ks[0], (3, 3, c_in, c_feat), jnp.float32) * math.sqrt(
        2.0 / (3 * 3 * c_feat))
    conv_b = jnp.zeros((c_feat,), jnp.float32)

    def lin(k, fan_in, fan_out):
        # Linear: normal(0, 0.01), bias = 0.  Stored (fan_in, fan_out) = W^T.
        return (jax.random.normal(k, (fan_in, fan_out), jnp.float32) * 0.01,
                jnp.zeros((fan_out,), jnp.float32))

    cls_w, cls_b = lin(ks[1], flat, hidden)
    emd_w, emd_b = lin(ks[2], hidden, hidden)
    var_w, var_b = lin(ks[3], hidden, hidden)
    fin_w, fin_b = lin(ks[4], hidden, num_out)

    # cls_w rows are generated in PyTorch NCHW-flatten order; permute them once
    # into NHWC-flatten order so the forward needs no runtime transpose.
    nchw_idx = jnp.arange(flat).reshape(c_feat, h2, w2)
    nhwc_order = jnp.transpose(nchw_idx, (1, 2, 0)).reshape(-1)
    cls_w = cls_w[nhwc_order]

    # BatchNorm1d(eps=1e-3, affine=False) eval-mode = fixed scale -> fold in.
    bn_scale = 1.0 / math.sqrt(1.0 + 1e-3)
    var_w = var_w * bn_scale
    var_b = var_b * bn_scale

    # ---- padded / bf16 / fused layouts, built ONCE here (not per forward) ---
    ckp = _round_up(9 * c_in, 128)          # conv-matmul K
    cfp = _round_up(c_feat, 128)            # conv-matmul N (feature channels)
    flp = _round_up(flat, 128)              # classifier K
    hp = _round_up(hidden, 128)             # hidden, padded
    op = _round_up(num_out, 128)            # output neurons, padded

    params = dict(
        conv_w=_pad2d(conv_w.reshape(9 * c_in, c_feat), ckp, cfp).astype(jnp.bfloat16),
        conv_b=_pad2d(conv_b.reshape(1, -1), 1, cfp).astype(jnp.float32),
        cls_w=_pad2d(cls_w, flp, hp).astype(jnp.bfloat16),
        cls_b=_pad2d(cls_b.reshape(1, -1), 1, hp).astype(jnp.float32),
        # emd and var share the same LHS -> one fused matmul over [emd_w | var_w]
        ev_w=jnp.concatenate([_pad2d(emd_w, hp, hp), _pad2d(var_w, hp, hp)],
                             axis=1).astype(jnp.bfloat16),
        ev_b=jnp.concatenate([_pad2d(emd_b.reshape(1, -1), 1, hp),
                              _pad2d(var_b.reshape(1, -1), 1, hp)],
                             axis=1).astype(jnp.float32),
        # 1.0 on emd columns (ReLU), 0.0 on var columns (identity, BN folded).
        ev_relu_mask=jnp.concatenate(
            [jnp.ones((1, hp), jnp.float32), jnp.zeros((1, hp), jnp.float32)],
            axis=1),
        # zero std on padded hidden columns so padded-K noise is neutralised.
        std_col_mask=(jnp.arange(hp) < hidden).astype(jnp.float32).reshape(1, hp),
        fin_w=_pad2d(fin_w, hp, op).astype(jnp.bfloat16),
        fin_b=_pad2d(fin_b.reshape(1, -1), 1, op).astype(jnp.float32),
    )
    dims = dict(c_feat=c_feat, hidden=hidden, num_out=num_out, flat=flat,
                ckp=ckp, cfp=cfp, flp=flp, hp=hp, op=op)
    return params, dims


# ----------------------------------------------------------------------------
# Forward pass
# ----------------------------------------------------------------------------
def vgg_forward(params, x_nchw, noise_key, dims, *, max_t=4, use_sto=True):
    B, C, H, W = x_nchw.shape
    c_feat, hidden, num_out = dims["c_feat"], dims["hidden"], dims["num_out"]
    ckp, cfp, flp, hp = dims["ckp"], dims["cfp"], dims["flp"], dims["hp"]

    # --- features (scaled stand-in for the external `features` module):
    # Conv3x3(pad=1)+ReLU lowered to bf16 im2col + tiled Pallas matmul, then
    # a 2x2 maxpool in bf16.
    # TODO(synk): replace the im2col with an in-kernel halo'd conv (9 shifted
    # matmuls from a VMEM-resident tile) with fused maxpool to remove the 9x
    # patch expansion at real VGG sizes.
    x = jnp.transpose(x_nchw, (0, 2, 3, 1)).astype(jnp.bfloat16)       # NHWC
    xpad = jnp.pad(x, ((0, 0), (1, 1), (1, 1), (0, 0)))
    patches = jnp.concatenate(
        [xpad[:, di:di + H, dj:dj + W, :] for di in range(3) for dj in range(3)],
        axis=-1)                                                        # (B,H,W,9C)
    m_conv = B * H * W
    mp_conv = _round_up(m_conv, 16)
    patches2d = _pad2d(patches.reshape(m_conv, 9 * C), mp_conv, ckp)
    feat = padded_linear(patches2d, params["conv_w"], params["conv_b"],
                         relu=True, out_dtype=jnp.bfloat16)             # (Mp,cfp)
    feat = feat[:m_conv].reshape(B, H, W, cfp)
    feat = feat.reshape(B, H // 2, 2, W // 2, 2, cfp).max(axis=(2, 4))  # bf16 pool
    # NHWC flatten; cls_w rows were permuted at init to match this order.
    feat2d = feat[..., :c_feat].reshape(B, -1)                          # (B, flat)
    bp_rows = _round_up(B, 16)
    feat2d = _pad2d(feat2d, bp_rows, flp)

    # --- classifier: Linear + ReLU (+ Dropout -> identity in eval mode).
    # Activation stays padded + bf16 for the next fused matmul.
    xcls = padded_linear(feat2d, params["cls_w"], params["cls_b"],
                         relu=True, out_dtype=jnp.bfloat16)             # (bp, hp)

    # --- emd (Linear+ReLU) and var (Linear + BN1d eval, folded) fused.
    ev = padded_linear_masked_relu(xcls, params["ev_w"], params["ev_b"],
                                   params["ev_relu_mask"],
                                   out_dtype=jnp.float32)               # (bp, 2hp)
    emb_p = ev[:B, :hp]
    log_var_p = ev[:B, hp:2 * hp]
    emb = emb_p[:, :hidden]
    log_var = log_var_p[:, :hidden]

    if use_sto:
        # std computed ONCE per forward; zero on padded columns (correctness:
        # neutralises the noise generated in padded K columns).
        std_p = jnp.exp(0.5 * log_var_p) * params["std_col_mask"]
        tp = _round_up(max_t, 16)
        # TODO(synk): draw the Gaussian noise in-kernel (pltpu.prng_seed +
        # pltpu.prng_random_bits) to remove this HBM stream; bf16 halves it.
        noise = jax.random.normal(noise_key, (B, tp, hp), jnp.bfloat16)
        logit = sto_final_pallas(emb_p.reshape(B, 1, hp),
                                 std_p.reshape(B, 1, hp),
                                 noise, params["fin_w"], params["fin_b"],
                                 max_t=max_t, num_out=num_out)
    else:
        xf = _pad2d(emb_p, bp_rows, hp).astype(jnp.bfloat16)
        out = padded_linear(xf, params["fin_w"], params["fin_b"],
                            relu=False, out_dtype=jnp.float32)
        logit = out[:B, :num_out]

    return logit, emb, log_var


# ----------------------------------------------------------------------------
if __name__ == "__main__":
    key = jax.random.PRNGKey(0)
    pkey, xkey, nkey = jax.random.split(key, 3)

    # Small shapes: batch=2, in-channels=4, spatial=16x16, feature-channels=8,
    # hidden=128 (stands in for 4096), num_output_neurons=10, max_t=4 (for 50).
    B, C, Hs, Ws = 2, 4, 16, 16
    C_FEAT, HIDDEN, NUM_OUT, MAX_T = 8, 128, 10, 4

    params, dims = init_params(pkey, c_in=C, c_feat=C_FEAT, h=Hs, w=Ws,
                               hidden=HIDDEN, num_out=NUM_OUT)
    x = jax.random.normal(xkey, (B, C, Hs, Ws), jnp.float32)

    fwd = jax.jit(functools.partial(vgg_forward, dims=dims, max_t=MAX_T,
                                    use_sto=True))
    logit, emb, log_var = fwd(params, x, nkey)
    jax.block_until_ready((logit, emb, log_var))

    assert logit.shape == (MAX_T, B, NUM_OUT)
    assert emb.shape == (B, HIDDEN)
    assert log_var.shape == (B, HIDDEN)
    assert bool(jnp.all(jnp.isfinite(logit)))
    assert bool(jnp.all(jnp.isfinite(emb)))
    assert bool(jnp.all(jnp.isfinite(log_var)))

    # deterministic (use_sto=False) branch
    fwd_det = jax.jit(functools.partial(vgg_forward, dims=dims, max_t=MAX_T,
                                        use_sto=False))
    logit_d, emb_d, log_var_d = fwd_det(params, x, nkey)
    jax.block_until_ready((logit_d, emb_d, log_var_d))
    assert logit_d.shape == (B, NUM_OUT)
    assert bool(jnp.all(jnp.isfinite(logit_d)))

    print("KERNEL_OK")
</pallas_src>

<mosaic_0001>
module attributes {stable_mosaic.version = 11 : i64} {
  func.func @_linear_kernel(%arg0: i32, %arg1: i32, %arg2: i32, %arg3: memref<256x128xbf16, #tpu.memory_space<vmem>>, %arg4: memref<128x128xbf16, #tpu.memory_space<vmem>>, %arg5: memref<1x128xf32, #tpu.memory_space<vmem>>, %arg6: memref<256x128xbf16, #tpu.memory_space<vmem>>, %arg7: memref<256x128xf32, #tpu.memory_space<vmem>>) attributes {dimension_semantics = [#tpu.dimension_semantics<parallel>, #tpu.dimension_semantics<parallel>, #tpu.dimension_semantics<arbitrary>], iteration_bounds = array<i64: 2, 1, 1>, scalar_prefetch = 0 : i64, scratch_operands = 1 : i64, tpu.core_type = #tpu.core_type<tc>, window_params = [{transform_indices = @transform_0, window_bounds = array<i64: 256, 128>}, {transform_indices = @transform_1, window_bounds = array<i64: 128, 128>}, {transform_indices = @transform_2, window_bounds = array<i64: 1, 128>}, {transform_indices = @transform_3, window_bounds = array<i64: 256, 128>}]} {
    %c0_i32 = arith.constant 0 : i32
    %0 = arith.cmpi eq, %arg2, %c0_i32 : i32
    %1 = arith.extui %0 : i1 to i32
    %c0_i32_0 = arith.constant 0 : i32
    %2 = arith.cmpi ne, %1, %c0_i32_0 : i32
    scf.if %2 {
      %cst_10 = arith.constant 0.000000e+00 : f32
      %12 = vector.broadcast %cst_10 : f32 to vector<256x128xf32>
      %c0_11 = arith.constant 0 : index
      %c0_12 = arith.constant 0 : index
      %13 = vector.load %arg7[%c0_11, %c0_12] : memref<256x128xf32, #tpu.memory_space<vmem>>, vector<256x128xf32>
      tpu.vector_store %arg7[%c0_11, %c0_12], %12 {strides = array<i32>} : memref<256x128xf32, #tpu.memory_space<vmem>>, vector<256x128xf32>,
    } else {
    }
    %c0 = arith.constant 0 : index
    %c0_1 = arith.constant 0 : index
    %3 = vector.load %arg7[%c0, %c0_1] : memref<256x128xf32, #tpu.memory_space<vmem>>, vector<256x128xf32>
    %c0_2 = arith.constant 0 : index
    %c0_3 = arith.constant 0 : index
    %4 = vector.load %arg3[%c0_2, %c0_3] : memref<256x128xbf16, #tpu.memory_space<vmem>>, vector<256x128xbf16>
    %c0_4 = arith.constant 0 : index
    %c0_5 = arith.constant 0 : index
    %5 = vector.load %arg4[%c0_4, %c0_5] : memref<128x128xbf16, #tpu.memory_space<vmem>>, vector<128x128xbf16>
    %cst = arith.constant dense<0.000000e+00> : vector<256x128xf32>
    %6 = tpu.matmul %4, %5, %cst {dimension_numbers = #tpu.dot_dimension_numbers<[1], [0], [0], [1], [0, 0, 1, 1], [], []>} : vector<256x128xbf16>, vector<128x128xbf16>, vector<256x128xf32> -> vector<256x128xf32>
    %7 = arith.addf %3, %6 : vector<256x128xf32>
    %c0_6 = arith.constant 0 : index
    %c0_7 = arith.constant 0 : index
    %8 = vector.load %arg7[%c0_6, %c0_7] : memref<256x128xf32, #tpu.memory_space<vmem>>, vector<256x128xf32>
    tpu.vector_store %arg7[%c0_6, %c0_7], %7 {strides = array<i32>} : memref<256x128xf32, #tpu.memory_space<vmem>>, vector<256x128xf32>,
    %c0_i32_8 = arith.constant 0 : i32
    %9 = arith.cmpi eq, %arg2, %c0_i32_8 : i32
    %10 = arith.extui %9 : i1 to i32
    %c0_i32_9 = arith.constant 0 : i32
    %11 = arith.cmpi ne, %10, %c0_i32_9 : i32
    scf.if %11 {
      %c0_10 = arith.constant 0 : index
      %c0_11 = arith.constant 0 : index
      %12 = vector.load %arg7[%c0_10, %c0_11] : memref<256x128xf32, #tpu.memory_space<vmem>>, vector<256x128xf32>
      %c0_12 = arith.constant 0 : index
      %c0_13 = arith.constant 0 : index
      %13 = vector.load %arg5[%c0_12, %c0_13] : memref<1x128xf32, #tpu.memory_space<vmem>>, vector<1x128xf32>
      %14 = vector.broadcast %13 : vector<1x128xf32> to vector<256x128xf32>
      %15 = arith.addf %12, %14 : vector<256x128xf32>
      %cst_14 = arith.constant 0.000000e+00 : f32
      %16 = vector.broadcast %cst_14 : f32 to vector<256x128xf32>
      %17 = arith.maximumf %15, %16 : vector<256x128xf32>
      %18 = arith.truncf %17 : vector<256x128xf32> to vector<256x128xbf16>
      %c0_15 = arith.constant 0 : index
      %c0_16 = arith.constant 0 : index
      %19 = vector.load %arg6[%c0_15, %c0_16] : memref<256x128xbf16, #tpu.memory_space<vmem>>, vector<256x128xbf16>
      tpu.vector_store %arg6[%c0_15, %c0_16], %18 {strides = array<i32>} : memref<256x128xbf16, #tpu.memory_space<vmem>>, vector<256x128xbf16>,
    } else {
    }
    return
  }
  func.func @transform_0(%arg0: i32, %arg1: i32, %arg2: i32) -> (i32, i32) {
    %c0_i32 = arith.constant 0 : i32
    return %arg0, %arg2 : i32, i32
  }
  func.func @transform_1(%arg0: i32, %arg1: i32, %arg2: i32) -> (i32, i32) {
    %c0_i32 = arith.constant 0 : i32
    return %arg2, %arg1 : i32, i32
  }
  func.func @transform_2(%arg0: i32, %arg1: i32, %arg2: i32) -> (i32, i32) {
    %c0_i32 = arith.constant 0 : i32
    %c0_i32_0 = arith.constant 0 : i32
    return %c0_i32, %arg1 : i32, i32
  }
  func.func @transform_3(%arg0: i32, %arg1: i32, %arg2: i32) -> (i32, i32) {
    %c0_i32 = arith.constant 0 : i32
    return %arg0, %arg1 : i32, i32
  }
}

module attributes {stable_mosaic.version = 11 : i64} {
  func.func @_linear_kernel(%arg0: i32, %arg1: i32, %arg2: i32, %arg3: memref<16x512xbf16, #tpu.memory_space<vmem>>, %arg4: memref<512x128xbf16, #tpu.memory_space<vmem>>, %arg5: memref<1x128xf32, #tpu.memory_space<vmem>>, %arg6: memref<16x128xbf16, #tpu.memory_space<vmem>>, %arg7: memref<16x128xf32, #tpu.memory_space<vmem>>) attributes {dimension_semantics = [#tpu.dimension_semantics<parallel>, #tpu.dimension_semantics<parallel>, #tpu.dimension_semantics<arbitrary>], iteration_bounds = array<i64: 1, 1, 1>, scalar_prefetch = 0 : i64, scratch_operands = 1 : i64, tpu.core_type = #tpu.core_type<tc>, window_params = [{transform_indices = @transform_0, window_bounds = array<i64: 16, 512>}, {transform_indices = @transform_1, window_bounds = array<i64: 512, 128>}, {transform_indices = @transform_2, window_bounds = array<i64: 1, 128>}, {transform_indices = @transform_3, window_bounds = array<i64: 16, 128>}]} {
    %c0_i32 = arith.constant 0 : i32
    %0 = arith.cmpi eq, %arg2, %c0_i32 : i32
    %1 = arith.extui %0 : i1 to i32
    %c0_i32_0 = arith.constant 0 : i32
    %2 = arith.cmpi ne, %1, %c0_i32_0 : i32
    scf.if %2 {
      %cst_10 = arith.constant 0.000000e+00 : f32
      %12 = vector.broadcast %cst_10 : f32 to vector<16x128xf32>
      %c0_11 = arith.constant 0 : index
      %c0_12 = arith.constant 0 : index
      %13 = vector.load %arg7[%c0_11, %c0_12] : memref<16x128xf32, #tpu.memory_space<vmem>>, vector<16x128xf32>
      tpu.vector_store %arg7[%c0_11, %c0_12], %12 {strides = array<i32>} : memref<16x128xf32, #tpu.memory_space<vmem>>, vector<16x128xf32>,
    } else {
    }
    %c0 = arith.constant 0 : index
    %c0_1 = arith.constant 0 : index
    %3 = vector.load %arg7[%c0, %c0_1] : memref<16x128xf32, #tpu.memory_space<vmem>>, vector<16x128xf32>
    %c0_2 = arith.constant 0 : index
    %c0_3 = arith.constant 0 : index
    %4 = vector.load %arg3[%c0_2, %c0_3] : memref<16x512xbf16, #tpu.memory_space<vmem>>, vector<16x512xbf16>
    %c0_4 = arith.constant 0 : index
    %c0_5 = arith.constant 0 : index
    %5 = vector.load %arg4[%c0_4, %c0_5] : memref<512x128xbf16, #tpu.memory_space<vmem>>, vector<512x128xbf16>
    %cst = arith.constant dense<0.000000e+00> : vector<16x128xf32>
    %6 = tpu.matmul %4, %5, %cst {dimension_numbers = #tpu.dot_dimension_numbers<[1], [0], [0], [1], [0, 0, 1, 1], [], []>} : vector<16x512xbf16>, vector<512x128xbf16>, vector<16x128xf32> -> vector<16x128xf32>
    %7 = arith.addf %3, %6 : vector<16x128xf32>
    %c0_6 = arith.constant 0 : index
    %c0_7 = arith.constant 0 : index
    %8 = vector.load %arg7[%c0_6, %c0_7] : memref<16x128xf32, #tpu.memory_space<vmem>>, vector<16x128xf32>
    tpu.vector_store %arg7[%c0_6, %c0_7], %7 {strides = array<i32>} : memref<16x128xf32, #tpu.memory_space<vmem>>, vector<16x128xf32>,
    %c0_i32_8 = arith.constant 0 : i32
    %9 = arith.cmpi eq, %arg2, %c0_i32_8 : i32
    %10 = arith.extui %9 : i1 to i32
    %c0_i32_9 = arith.constant 0 : i32
    %11 = arith.cmpi ne, %10, %c0_i32_9 : i32
    scf.if %11 {
      %c0_10 = arith.constant 0 : index
      %c0_11 = arith.constant 0 : index
      %12 = vector.load %arg7[%c0_10, %c0_11] : memref<16x128xf32, #tpu.memory_space<vmem>>, vector<16x128xf32>
      %c0_12 = arith.constant 0 : index
      %c0_13 = arith.constant 0 : index
      %13 = vector.load %arg5[%c0_12, %c0_13] : memref<1x128xf32, #tpu.memory_space<vmem>>, vector<1x128xf32>
      %14 = vector.broadcast %13 : vector<1x128xf32> to vector<16x128xf32>
      %15 = arith.addf %12, %14 : vector<16x128xf32>
      %cst_14 = arith.constant 0.000000e+00 : f32
      %16 = vector.broadcast %cst_14 : f32 to vector<16x128xf32>
      %17 = arith.maximumf %15, %16 : vector<16x128xf32>
      %18 = arith.truncf %17 : vector<16x128xf32> to vector<16x128xbf16>
      %c0_15 = arith.constant 0 : index
      %c0_16 = arith.constant 0 : index
      %19 = vector.load %arg6[%c0_15, %c0_16] : memref<16x128xbf16, #tpu.memory_space<vmem>>, vector<16x128xbf16>
      tpu.vector_store %arg6[%c0_15, %c0_16], %18 {strides = array<i32>} : memref<16x128xbf16, #tpu.memory_space<vmem>>, vector<16x128xbf16>,
    } else {
    }
    return
  }
  func.func @transform_0(%arg0: i32, %arg1: i32, %arg2: i32) -> (i32, i32) {
    %c0_i32 = arith.constant 0 : i32
    return %arg0, %arg2 : i32, i32
  }
  func.func @transform_1(%arg0: i32, %arg1: i32, %arg2: i32) -> (i32, i32) {
    %c0_i32 = arith.constant 0 : i32
    return %arg2, %arg1 : i32, i32
  }
  func.func @transform_2(%arg0: i32, %arg1: i32, %arg2: i32) -> (i32, i32) {
    %c0_i32 = arith.constant 0 : i32
    %c0_i32_0 = arith.constant 0 : i32
    return %c0_i32, %arg1 : i32, i32
  }
  func.func @transform_3(%arg0: i32, %arg1: i32, %arg2: i32) -> (i32, i32) {
    %c0_i32 = arith.constant 0 : i32
    return %arg0, %arg1 : i32, i32
  }
}

module attributes {stable_mosaic.version = 11 : i64} {
  func.func @_masked_relu_linear_kernel(%arg0: i32, %arg1: i32, %arg2: i32, %arg3: memref<16x128xbf16, #tpu.memory_space<vmem>>, %arg4: memref<128x256xbf16, #tpu.memory_space<vmem>>, %arg5: memref<1x256xf32, #tpu.memory_space<vmem>>, %arg6: memref<1x256xf32, #tpu.memory_space<vmem>>, %arg7: memref<16x256xf32, #tpu.memory_space<vmem>>, %arg8: memref<16x256xf32, #tpu.memory_space<vmem>>) attributes {dimension_semantics = [#tpu.dimension_semantics<parallel>, #tpu.dimension_semantics<parallel>, #tpu.dimension_semantics<arbitrary>], iteration_bounds = array<i64: 1, 1, 1>, scalar_prefetch = 0 : i64, scratch_operands = 1 : i64, tpu.core_type = #tpu.core_type<tc>, window_params = [{transform_indices = @transform_0, window_bounds = array<i64: 16, 128>}, {transform_indices = @transform_1, window_bounds = array<i64: 128, 256>}, {transform_indices = @transform_2, window_bounds = array<i64: 1, 256>}, {transform_indices = @transform_3, window_bounds = array<i64: 1, 256>}, {transform_indices = @transform_4, window_bounds = array<i64: 16, 256>}]} {
    %c0_i32 = arith.constant 0 : i32
    %0 = arith.cmpi eq, %arg2, %c0_i32 : i32
    %1 = arith.extui %0 : i1 to i32
    %c0_i32_0 = arith.constant 0 : i32
    %2 = arith.cmpi ne, %1, %c0_i32_0 : i32
    scf.if %2 {
      %cst_10 = arith.constant 0.000000e+00 : f32
      %12 = vector.broadcast %cst_10 : f32 to vector<16x256xf32>
      %c0_11 = arith.constant 0 : index
      %c0_12 = arith.constant 0 : index
      %13 = vector.load %arg8[%c0_11, %c0_12] : memref<16x256xf32, #tpu.memory_space<vmem>>, vector<16x256xf32>
      tpu.vector_store %arg8[%c0_11, %c0_12], %12 {strides = array<i32>} : memref<16x256xf32, #tpu.memory_space<vmem>>, vector<16x256xf32>,
    } else {
    }
    %c0 = arith.constant 0 : index
    %c0_1 = arith.constant 0 : index
    %3 = vector.load %arg8[%c0, %c0_1] : memref<16x256xf32, #tpu.memory_space<vmem>>, vector<16x256xf32>
    %c0_2 = arith.constant 0 : index
    %c0_3 = arith.constant 0 : index
    %4 = vector.load %arg3[%c0_2, %c0_3] : memref<16x128xbf16, #tpu.memory_space<vmem>>, vector<16x128xbf16>
    %c0_4 = arith.constant 0 : index
    %c0_5 = arith.constant 0 : index
    %5 = vector.load %arg4[%c0_4, %c0_5] : memref<128x256xbf16, #tpu.memory_space<vmem>>, vector<128x256xbf16>
    %cst = arith.constant dense<0.000000e+00> : vector<16x256xf32>
    %6 = tpu.matmul %4, %5, %cst {dimension_numbers = #tpu.dot_dimension_numbers<[1], [0], [0], [1], [0, 0, 1, 1], [], []>} : vector<16x128xbf16>, vector<128x256xbf16>, vector<16x256xf32> -> vector<16x256xf32>
    %7 = arith.addf %3, %6 : vector<16x256xf32>
    %c0_6 = arith.constant 0 : index
    %c0_7 = arith.constant 0 : index
    %8 = vector.load %arg8[%c0_6, %c0_7] : memref<16x256xf32, #tpu.memory_space<vmem>>, vector<16x256xf32>
    tpu.vector_store %arg8[%c0_6, %c0_7], %7 {strides = array<i32>} : memref<16x256xf32, #tpu.memory_space<vmem>>, vector<16x256xf32>,
    %c0_i32_8 = arith.constant 0 : i32
    %9 = arith.cmpi eq, %arg2, %c0_i32_8 : i32
    %10 = arith.extui %9 : i1 to i32
    %c0_i32_9 = arith.constant 0 : i32
    %11 = arith.cmpi ne, %10, %c0_i32_9 : i32
    scf.if %11 {
      %c0_10 = arith.constant 0 : index
      %c0_11 = arith.constant 0 : index
      %12 = vector.load %arg8[%c0_10, %c0_11] : memref<16x256xf32, #tpu.memory_space<vmem>>, vector<16x256xf32>
      %c0_12 = arith.constant 0 : index
      %c0_13 = arith.constant 0 : index
      %13 = vector.load %arg5[%c0_12, %c0_13] : memref<1x256xf32, #tpu.memory_space<vmem>>, vector<1x256xf32>
      %14 = vector.broadcast %13 : vector<1x256xf32> to vector<16x256xf32>
      %15 = arith.addf %12, %14 : vector<16x256xf32>
      %c0_14 = arith.constant 0 : index
      %c0_15 = arith.constant 0 : index
      %16 = vector.load %arg6[%c0_14, %c0_15] : memref<1x256xf32, #tpu.memory_space<vmem>>, vector<1x256xf32>
      %cst_16 = arith.constant 5.000000e-01 : f32
      %17 = vector.broadcast %cst_16 : f32 to vector<1x256xf32>
      %18 = arith.cmpf ogt, %16, %17 : vector<1x256xf32>
      %cst_17 = arith.constant 0.000000e+00 : f32
      %19 = vector.broadcast %cst_17 : f32 to vector<16x256xf32>
      %20 = arith.maximumf %15, %19 : vector<16x256xf32>
      %21 = vector.shape_cast %18 : vector<1x256xi1> to vector<1x256xi1>
      %22 = vector.broadcast %21 : vector<1x256xi1> to vector<16x256xi1>
      %23 = arith.select %22, %20, %15 : vector<16x256xi1>, vector<16x256xf32>
      %c0_18 = arith.constant 0 : index
      %c0_19 = arith.constant 0 : index
      %24 = vector.load %arg7[%c0_18, %c0_19] : memref<16x256xf32, #tpu.memory_space<vmem>>, vector<16x256xf32>
      tpu.vector_store %arg7[%c0_18, %c0_19], %23 {strides = array<i32>} : memref<16x256xf32, #tpu.memory_space<vmem>>, vector<16x256xf32>,
    } else {
    }
    return
  }
  func.func @transform_0(%arg0: i32, %arg1: i32, %arg2: i32) -> (i32, i32) {
    %c0_i32 = arith.constant 0 : i32
    return %arg0, %arg2 : i32, i32
  }
  func.func @transform_1(%arg0: i32, %arg1: i32, %arg2: i32) -> (i32, i32) {
    %c0_i32 = arith.constant 0 : i32
    return %arg2, %arg1 : i32, i32
  }
  func.func @transform_2(%arg0: i32, %arg1: i32, %arg2: i32) -> (i32, i32) {
    %c0_i32 = arith.constant 0 : i32
    %c0_i32_0 = arith.constant 0 : i32
    return %c0_i32, %arg1 : i32, i32
  }
  func.func @transform_3(%arg0: i32, %arg1: i32, %arg2: i32) -> (i32, i32) {
    %c0_i32 = arith.constant 0 : i32
    %c0_i32_0 = arith.constant 0 : i32
    return %c0_i32, %arg1 : i32, i32
  }
  func.func @transform_4(%arg0: i32, %arg1: i32, %arg2: i32) -> (i32, i32) {
    %c0_i32 = arith.constant 0 : i32
    return %arg0, %arg1 : i32, i32
  }
}

module attributes {stable_mosaic.version = 11 : i64} {
  func.func @_sto_final_kernel(%arg0: i32, %arg1: i32, %arg2: i32, %arg3: i32, %arg4: memref<1x1x128xf32, #tpu.memory_space<vmem>>, %arg5: memref<1x1x128xf32, #tpu.memory_space<vmem>>, %arg6: memref<1x16x128xbf16, #tpu.memory_space<vmem>>, %arg7: memref<128x128xbf16, #tpu.memory_space<vmem>>, %arg8: memref<1x128xf32, #tpu.memory_space<vmem>>, %arg9: memref<16x128xf32, #tpu.memory_space<vmem>>, %arg10: memref<16x128xf32, #tpu.memory_space<vmem>>) attributes {dimension_semantics = [#tpu.dimension_semantics<parallel>, #tpu.dimension_semantics<parallel>, #tpu.dimension_semantics<parallel>, #tpu.dimension_semantics<arbitrary>], iteration_bounds = array<i64: 2, 1, 1, 1>, scalar_prefetch = 0 : i64, scratch_operands = 1 : i64, tpu.core_type = #tpu.core_type<tc>, window_params = [{transform_indices = @transform_0, window_bounds = array<i64: 1, 1, 128>}, {transform_indices = @transform_1, window_bounds = array<i64: 1, 1, 128>}, {transform_indices = @transform_2, window_bounds = array<i64: 1, 16, 128>}, {transform_indices = @transform_3, window_bounds = array<i64: 128, 128>}, {transform_indices = @transform_4, window_bounds = array<i64: 1, 128>}, {transform_indices = @transform_5, window_bounds = array<i64: 16, 128>}]} {
    %c0_i32 = arith.constant 0 : i32
    %0 = arith.cmpi eq, %arg3, %c0_i32 : i32
    %1 = arith.extui %0 : i1 to i32
    %c0_i32_0 = arith.constant 0 : i32
    %2 = arith.cmpi ne, %1, %c0_i32_0 : i32
    scf.if %2 {
      %cst_17 = arith.constant 0.000000e+00 : f32
      %23 = vector.broadcast %cst_17 : f32 to vector<16x128xf32>
      %c0_18 = arith.constant 0 : index
      %c0_19 = arith.constant 0 : index
      %24 = vector.load %arg10[%c0_18, %c0_19] : memref<16x128xf32, #tpu.memory_space<vmem>>, vector<16x128xf32>
      tpu.vector_store %arg10[%c0_18, %c0_19], %23 {strides = array<i32>} : memref<16x128xf32, #tpu.memory_space<vmem>>, vector<16x128xf32>,
    } else {
    }
    %c0 = arith.constant 0 : index
    %c0_1 = arith.constant 0 : index
    %c0_2 = arith.constant 0 : index
    %3 = vector.load %arg4[%c0, %c0_1, %c0_2] : memref<1x1x128xf32, #tpu.memory_space<vmem>>, vector<1x1x128xf32>
    %4 = vector.shape_cast %3 : vector<1x1x128xf32> to vector<1x128xf32>
    %c0_3 = arith.constant 0 : index
    %c0_4 = arith.constant 0 : index
    %c0_5 = arith.constant 0 : index
    %5 = vector.load %arg5[%c0_3, %c0_4, %c0_5] : memref<1x1x128xf32, #tpu.memory_space<vmem>>, vector<1x1x128xf32>
    %6 = vector.shape_cast %5 : vector<1x1x128xf32> to vector<1x128xf32>
    %c0_6 = arith.constant 0 : index
    %c0_7 = arith.constant 0 : index
    %c0_8 = arith.constant 0 : index
    %7 = vector.load %arg6[%c0_6, %c0_7, %c0_8] : memref<1x16x128xbf16, #tpu.memory_space<vmem>>, vector<1x16x128xbf16>
    %8 = vector.shape_cast %7 : vector<1x16x128xbf16> to vector<16x128xbf16>
    %9 = arith.extf %8 : vector<16x128xbf16> to vector<16x128xf32>
    %10 = vector.broadcast %6 : vector<1x128xf32> to vector<16x128xf32>
    %11 = arith.mulf %10, %9 : vector<16x128xf32>
    %12 = vector.broadcast %4 : vector<1x128xf32> to vector<16x128xf32>
    %13 = arith.addf %12, %11 : vector<16x128xf32>
    %c0_9 = arith.constant 0 : index
    %c0_10 = arith.constant 0 : index
    %14 = vector.load %arg10[%c0_9, %c0_10] : memref<16x128xf32, #tpu.memory_space<vmem>>, vector<16x128xf32>
    %15 = arith.truncf %13 : vector<16x128xf32> to vector<16x128xbf16>
    %c0_11 = arith.constant 0 : index
    %c0_12 = arith.constant 0 : index
    %16 = vector.load %arg7[%c0_11, %c0_12] : memref<128x128xbf16, #tpu.memory_space<vmem>>, vector<128x128xbf16>
    %cst = arith.constant dense<0.000000e+00> : vector<16x128xf32>
    %17 = tpu.matmul %15, %16, %cst {dimension_numbers = #tpu.dot_dimension_numbers<[1], [0], [0], [1], [0, 0, 1, 1], [], []>} : vector<16x128xbf16>, vector<128x128xbf16>, vector<16x128xf32> -> vector<16x128xf32>
    %18 = arith.addf %14, %17 : vector<16x128xf32>
    %c0_13 = arith.constant 0 : index
    %c0_14 = arith.constant 0 : index
    %19 = vector.load %arg10[%c0_13, %c0_14] : memref<16x128xf32, #tpu.memory_space<vmem>>, vector<16x128xf32>
    tpu.vector_store %arg10[%c0_13, %c0_14], %18 {strides = array<i32>} : memref<16x128xf32, #tpu.memory_space<vmem>>, vector<16x128xf32>,
    %c0_i32_15 = arith.constant 0 : i32
    %20 = arith.cmpi eq, %arg3, %c0_i32_15 : i32
    %21 = arith.extui %20 : i1 to i32
    %c0_i32_16 = arith.constant 0 : i32
    %22 = arith.cmpi ne, %21, %c0_i32_16 : i32
    scf.if %22 {
      %c0_17 = arith.constant 0 : index
      %c0_18 = arith.constant 0 : index
      %23 = vector.load %arg10[%c0_17, %c0_18] : memref<16x128xf32, #tpu.memory_space<vmem>>, vector<16x128xf32>
      %c0_19 = arith.constant 0 : index
      %c0_20 = arith.constant 0 : index
      %24 = vector.load %arg8[%c0_19, %c0_20] : memref<1x128xf32, #tpu.memory_space<vmem>>, vector<1x128xf32>
      %25 = vector.broadcast %24 : vector<1x128xf32> to vector<16x128xf32>
      %26 = arith.addf %23, %25 : vector<16x128xf32>
      %c0_21 = arith.constant 0 : index
      %c0_22 = arith.constant 0 : index
      %27 = vector.load %arg9[%c0_21, %c0_22] : memref<16x128xf32, #tpu.memory_space<vmem>>, vector<16x128xf32>
      tpu.vector_store %arg9[%c0_21, %c0_22], %26 {strides = array<i32>} : memref<16x128xf32, #tpu.memory_space<vmem>>, vector<16x128xf32>,
    } else {
    }
    return
  }
  func.func @transform_0(%arg0: i32, %arg1: i32, %arg2: i32, %arg3: i32) -> (i32, i32, i32) {
    %c0_i32 = arith.constant 0 : i32
    %c0_i32_0 = arith.constant 0 : i32
    return %arg0, %c0_i32, %arg3 : i32, i32, i32
  }
  func.func @transform_1(%arg0: i32, %arg1: i32, %arg2: i32, %arg3: i32) -> (i32, i32, i32) {
    %c0_i32 = arith.constant 0 : i32
    %c0_i32_0 = arith.constant 0 : i32
    return %arg0, %c0_i32, %arg3 : i32, i32, i32
  }
  func.func @transform_2(%arg0: i32, %arg1: i32, %arg2: i32, %arg3: i32) -> (i32, i32, i32) {
    %c0_i32 = arith.constant 0 : i32
    return %arg0, %arg1, %arg3 : i32, i32, i32
  }
  func.func @transform_3(%arg0: i32, %arg1: i32, %arg2: i32, %arg3: i32) -> (i32, i32) {
    %c0_i32 = arith.constant 0 : i32
    return %arg3, %arg2 : i32, i32
  }
  func.func @transform_4(%arg0: i32, %arg1: i32, %arg2: i32, %arg3: i32) -> (i32, i32) {
    %c0_i32 = arith.constant 0 : i32
    %c0_i32_0 = arith.constant 0 : i32
    return %c0_i32, %arg2 : i32, i32
  }
  func.func @transform_5(%arg0: i32, %arg1: i32, %arg2: i32, %arg3: i32) -> (i32, i32) {
    %c1_i32 = arith.constant 1 : i32
    %0 = arith.muli %arg0, %c1_i32 : i32
    %1 = arith.addi %0, %arg2 : i32
    %c0_i32 = arith.constant 0 : i32
    return %arg1, %1 : i32, i32
  }
}

</mosaic_0001>

<bundles_post_ra>
// kernel: vgg_forward.4
= control target key start
LH: loop header
LB: loop body
LE: loop exit
PB: predicated region body
PF: predicated region fallthrough
CT: control target
= control target key end

     0   :  { %s1499_s12 = smov 0   ;;  %s1501_s13 = smov 0   ;;  %s1636_s0 = inlined_call_operand.vmem [shape: bf16[512,128], index: 0, kind: input, shape index: {}]   ;;  %s1637_s1 = inlined_call_operand.vmem [shape: bf16[128,128], index: 1, kind: input, shape index: {}]   ;;  %s1638_s2 = inlined_call_operand.vmem [shape: f32[1,128], index: 2, kind: input, shape index: {}]   ;;  %s1639_s3 = inlined_call_operand.vmem [shape: bf16[512,128], index: 3, kind: output, shape index: {}]  }
   0x1   :  { %s1503_s14 = smov 0  }
   0x2 LB: > { %s32_s15 = sadd.s32 1, %s1473_s13  ;;  %p1128_p0 = scmp.ge.s32.totalorder %s1477_s14, 1  ;;  %s1477_s14 = sphi %s1503_s14, %s13_s14   ;;  %s1473_s13 = sphi %s1501_s13, %s1641_s13   ;;  %s1469_s12 = sphi %s1499_s12, %s1640_s12  }
   0x3   : > { %p34_p1 = scmp.ge.s32.totalorder %s32_s15, 2  ;;  %p188_p2 = scmp.lt.s32.totalorder %s1477_s14, 3 }
   0x5   : > { %s1643_s15 = smov (%p34_p1, %s32_s15), 0  ;;  %p189_p3 = pnand %p1128_p0, %p188_p2 }
   0x6   : > { %v1431_v0 = vld [vmem:[%s1637_s1] sm:$0xff] (!%p189_p3)   ;;  %s1129_s18 = sshll.u32 (!%p189_p3), %s1469_s12, 5  ;;  %v1432_v1 = vld [vmem:[%s1637_s1 + $0x8] sm:$0xff] (!%p189_p3)   ;;  %v1433_v2 = vld [vmem:[%s1637_s1 + $0x10] sm:$0xff] (!%p189_p3)  }
   0x7   : > { %192 = sbr.rel (%p189_p3) target bundleno = 285 (0x11d), region = 32  ;;  %p230_p4 = scmp.lt.s32.totalorder (!%p189_p3), %s1129_s18, 63  ;;  %1343 = vmatprep.subr.bf16.mxu0 (!%p189_p3), %v1431_v0  ;;  %1391 = vmatprep.subr.bf16.mxu1 (!%p189_p3), %v1431_v0  ;;  %v1434_v3 = vld [vmem:[%s1637_s1 + $0x18] sm:$0xff] (!%p189_p3)   ;;  %v1435_v6 = vld [vmem:[%s1637_s1 + $0x20] sm:$0xff] (!%p189_p3)   ;;  %v1436_v7 = vld [vmem:[%s1637_s1 + $0x28] sm:$0xff] (!%p189_p3)  }
   0x8   : > { %1344 = vmatpush3.bf16.msra.mxu0 (!%p189_p3), %v1431_v0  ;;  %1399 = vmatpush3.bf16.msra.mxu1 (!%p189_p3), %v1431_v0  ;;  %v1437_v8 = vld [vmem:[%s1637_s1 + $0x30] sm:$0xff] (!%p189_p3)   ;;  %v1438_v9 = vld [vmem:[%s1637_s1 + $0x38] sm:$0xff] (!%p189_p3)   ;;  %v1570_v24 = vld [vmem:[%s1638_s2] ss:$0 sm:$0xff] (!%p189_p3) }
   0x9   : > { %1345 = vmatprep.subr.bf16.mxu0 (!%p189_p3), %v1432_v1  ;;  %1392 = vmatprep.subr.bf16.mxu1 (!%p189_p3), %v1432_v1 }
   0xc   : > { %1346 = vmatpush3.bf16.msra.mxu0 (!%p189_p3), %v1432_v1  ;;  %1400 = vmatpush3.bf16.msra.mxu1 (!%p189_p3), %v1432_v1 }
   0xd   : > { %1347 = vmatprep.subr.bf16.mxu0 (!%p189_p3), %v1433_v2  ;;  %1393 = vmatprep.subr.bf16.mxu1 (!%p189_p3), %v1433_v2 }
   0xe   : > { %s1645_s18 = smov (!%p230_p4, %s1129_s18), 63 }
   0xf   : > { %s1130_s23 = sshll.u32 %s1645_s18, 2 }
  0x10   : > { %s1534_s26 = scalar_lea.vmem %s1636_s0, %s1130_s23  ;;  %1348 = vmatpush3.bf16.msra.mxu0 %v1433_v2  ;;  %1401 = vmatpush3.bf16.msra.mxu1 %v1433_v2  ;;  %s1585_s17 = scalar_lea.vmem %s1639_s3, %s1130_s23 }
  0x11   : > { %v1439_v4 = vld [vmem:[%s1534_s26] sm:$0xff]   ;;  %1349 = vmatprep.subr.bf16.mxu0 %v1434_v3  ;;  %1394 = vmatprep.subr.bf16.mxu1 %v1434_v3  ;;  %v1441_v10 = vld [vmem:[%s1534_s26 + $0x8] sm:$0xff]   ;;  %v1443_v12 = vld [vmem:[%s1534_s26 + $0x10] sm:$0xff]  }
  0x12   : > { %v1440_v5 = vld [vmem:[%s1534_s26 + $0x40] sm:$0xff]   ;;  %1359 = vmatprep.mubr.bf16.mxu0 %v1439_v4  ;;  %v1442_v11 = vld [vmem:[%s1534_s26 + $0x48] sm:$0xff]   ;;  %v1444_v13 = vld [vmem:[%s1534_s26 + $0x50] sm:$0xff]  }
  0x13   : > { %1375 = vmatprep.mubr.bf16.mxu1 %v1440_v5  ;;  %v1445_v14 = vld [vmem:[%s1534_s26 + $0x18] sm:$0xff]   ;;  %v1447_v16 = vld [vmem:[%s1534_s26 + $0x20] sm:$0xff]   ;;  %v1449_v18 = vld [vmem:[%s1534_s26 + $0x28] sm:$0xff]  }
  0x14   : > { %1350 = vmatpush3.bf16.msra.mxu0 %v1434_v3  ;;  %1402 = vmatpush3.bf16.msra.mxu1 %v1434_v3  ;;  %v1446_v15 = vld [vmem:[%s1534_s26 + $0x58] sm:$0xff]   ;;  %v1448_v17 = vld [vmem:[%s1534_s26 + $0x60] sm:$0xff]   ;;  %v1450_v19 = vld [vmem:[%s1534_s26 + $0x68] sm:$0xff]  }
  0x15   : > { %1351 = vmatprep.subr.bf16.mxu0 %v1435_v6  ;;  %1395 = vmatprep.subr.bf16.mxu1 %v1435_v6  ;;  %v1451_v20 = vld [vmem:[%s1534_s26 + $0x30] sm:$0xff]   ;;  %v1453_v22 = vld [vmem:[%s1534_s26 + $0x38] sm:$0xff]  }
  0x16   : > { %v1452_v21 = vld [vmem:[%s1534_s26 + $0x70] sm:$0xff]   ;;  %v1454_v23 = vld [vmem:[%s1534_s26 + $0x78] sm:$0xff]  }
  0x18   : > { %1352 = vmatpush3.bf16.msra.mxu0 %v1435_v6  ;;  %1403 = vmatpush3.bf16.msra.mxu1 %v1435_v6 }
  0x19   : > { %1353 = vmatprep.subr.bf16.mxu0 %v1436_v7  ;;  %1396 = vmatprep.subr.bf16.mxu1 %v1436_v7 }
  0x1c   : > { %1354 = vmatpush3.bf16.msra.mxu0 %v1436_v7  ;;  %1404 = vmatpush3.bf16.msra.mxu1 %v1436_v7 }
  0x1d   : > { %1355 = vmatprep.subr.bf16.mxu0 %v1437_v8  ;;  %1397 = vmatprep.subr.bf16.mxu1 %v1437_v8 }
  0x20   : > { %1356 = vmatpush3.bf16.msra.mxu0 %v1437_v8  ;;  %1405 = vmatpush3.bf16.msra.mxu1 %v1437_v8 }
  0x21   : > { %1357 = vmatprep.subr.bf16.mxu0 %v1438_v9  ;;  %1398 = vmatprep.subr.bf16.mxu1 %v1438_v9 }
  0x24   : > { %1358 = vmatpush3.bf16.msra.mxu0 %v1438_v9  ;;  %1406 = vmatpush3.bf16.msra.mxu1 %v1438_v9 }
  0x27   : > { %1360 = vmatmul.mubr.bf16.vlgmr.msra.gmra.mrb[0].mxu0 %v1441_v10  ;;  %1376 = vmatmul.mubr.bf16.vlgmr.msra.gmra.mrb[0].mxu1 %v1442_v11 }
  0x28   : > { %1363 = vmatprep.mubr.bf16.mxu0 %v1443_v12  ;;  %1379 = vmatprep.mubr.bf16.mxu1 %v1444_v13 }
  0x2f   : > { %1364 = vmatmul.mubr.bf16.gmra.mrb[4].mxu0 %v1445_v14  ;;  %1380 = vmatmul.mubr.bf16.gmra.mrb[4].mxu1 %v1446_v15 }
  0x30   : > { %1367 = vmatprep.mubr.bf16.mxu0 %v1447_v16  ;;  %1383 = vmatprep.mubr.bf16.mxu1 %v1448_v17 }
  0x37   : > { %1368 = vmatmul.mubr.bf16.gmra.mrb[8].mxu0 %v1449_v18  ;;  %1384 = vmatmul.mubr.bf16.gmra.mrb[8].mxu1 %v1450_v19 }
  0x38   : > { %1371 = vmatprep.mubr.bf16.mxu0 %v1451_v20  ;;  %1387 = vmatprep.mubr.bf16.mxu1 %v1452_v21 }
  0x3f   : > { %1372 = vmatmul.mubr.bf16.gmra.mrb[12].mxu0 %v1453_v22  ;;  %1388 = vmatmul.mubr.bf16.gmra.mrb[12].mxu1 %v1454_v23 }
  0xfa   : > { %v1361_v25 = vpop.f32.mrb[0].mxu0  ;;  %v1377_v26 = vpop.f32.mrb[0].mxu1 }
  0xfb   : > { %v789_v27 = vadd.f32 %v1361_v25, %v1570_v24  ;;  %v805_v28 = vadd.f32 %v1377_v26, %v1570_v24  ;;  %v554_v29 = vpop.f32.mrb[1].mxu0  ;;  %v618_v30 = vpop.f32.mrb[1].mxu1 }
  0xfc   : > { %v787_v31 = vadd.f32 %v1570_v24, %v554_v29  ;;  %v803_v32 = vadd.f32 %v1570_v24, %v618_v30  ;;  %v1362_v33 = vpop.f32.mrb[2].mxu0  ;;  %v1378_v34 = vpop.f32.mrb[2].mxu1 }
  0xfd   : > { %v790_v35 = vadd.f32 %v1362_v33, %v1570_v24  ;;  %v806_v36 = vadd.f32 %v1378_v34, %v1570_v24  ;;  %v557_v37 = vpop.f32.mrb[3].mxu0  ;;  %v621_v38 = vpop.f32.mrb[3].mxu1  ;;  %v821_v41 = vmax.f32 %v789_v27, 0.0  ;;  %v837_v42 = vmax.f32 %v805_v28, 0.0 }
  0xfe   : > { %v788_v39 = vadd.f32 %v1570_v24, %v557_v37  ;;  %v804_v40 = vadd.f32 %v1570_v24, %v621_v38  ;;  %v819_v45 = vmax.f32 %v787_v31, 0.0  ;;  %v835_v46 = vmax.f32 %v803_v32, 0.0 }
  0xff   : > { %v822_v43 = vmax.f32 %v790_v35, 0.0  ;;  %v838_v44 = vmax.f32 %v806_v36, 0.0 }
 0x100   : > { %v820_v47 = vmax.f32 %v788_v39, 0.0  ;;  %v836_v48 = vmax.f32 %v804_v40, 0.0 }
 0x101   : > { %v1232_v49 = vpack.c.bf16 %v822_v43, %v821_v41  ;;  %v1272_v50 = vpack.c.bf16 %v838_v44, %v837_v42 }
 0x102   : > { %v1227_v51 = vpack.c.bf16 %v820_v47, %v819_v45  ;;  %v1267_v52 = vpack.c.bf16 %v836_v48, %v835_v46  ;;  %v1365_v53 = vpop.f32.mrb[4].mxu0  ;;  %v1381_v54 = vpop.f32.mrb[4].mxu1 }
 0x103   : > { %1304 = vst [vmem:[%s1585_s17 + $0x8] sm:$0xff] %v1232_v49   ;;  %1312 = vst [vmem:[%s1585_s17 + $0x48] sm:$0xff] %v1272_v50   ;;  %v793_v55 = vadd.f32 %v1365_v53, %v1570_v24  ;;  %v809_v56 = vadd.f32 %v1381_v54, %v1570_v24  ;;  %v570_v57 = vpop.f32.mrb[5].mxu0  ;;  %v634_v58 = vpop.f32.mrb[5].mxu1 }
 0x104   : > { %1228 = vst [vmem:[%s1585_s17] sm:$0xff] %v1227_v51   ;;  %1311 = vst [vmem:[%s1585_s17 + $0x40] sm:$0xff] %v1267_v52   ;;  %v791_v59 = vadd.f32 %v1570_v24, %v570_v57  ;;  %v807_v60 = vadd.f32 %v1570_v24, %v634_v58  ;;  %v1366_v61 = vpop.f32.mrb[6].mxu0  ;;  %v1382_v62 = vpop.f32.mrb[6].mxu1 }
 0x105   : > { %v794_v63 = vadd.f32 %v1366_v61, %v1570_v24  ;;  %v810_v0 = vadd.f32 %v1382_v62, %v1570_v24  ;;  %v573_v1 = vpop.f32.mrb[7].mxu0  ;;  %v637_v2 = vpop.f32.mrb[7].mxu1  ;;  %v825_v5 = vmax.f32 %v793_v55, 0.0  ;;  %v841_v6 = vmax.f32 %v809_v56, 0.0 }
 0x106   : > { %v792_v3 = vadd.f32 %v1570_v24, %v573_v1  ;;  %v808_v4 = vadd.f32 %v1570_v24, %v637_v2  ;;  %v823_v9 = vmax.f32 %v791_v59, 0.0  ;;  %v839_v10 = vmax.f32 %v807_v60, 0.0 }
 0x107   : > { %v826_v7 = vmax.f32 %v794_v63, 0.0  ;;  %v842_v8 = vmax.f32 %v810_v0, 0.0 }
 0x108   : > { %v824_v11 = vmax.f32 %v792_v3, 0.0  ;;  %v840_v12 = vmax.f32 %v808_v4, 0.0 }
 0x109   : > { %v1242_v13 = vpack.c.bf16 %v826_v7, %v825_v5  ;;  %v1282_v14 = vpack.c.bf16 %v842_v8, %v841_v6 }
 0x10a   : > { %v1237_v15 = vpack.c.bf16 %v824_v11, %v823_v9  ;;  %v1277_v16 = vpack.c.bf16 %v840_v12, %v839_v10  ;;  %v1369_v17 = vpop.f32.mrb[8].mxu0  ;;  %v1385_v18 = vpop.f32.mrb[8].mxu1 }
 0x10b   : > { %1306 = vst [vmem:[%s1585_s17 + $0x18] sm:$0xff] %v1242_v13   ;;  %1314 = vst [vmem:[%s1585_s17 + $0x58] sm:$0xff] %v1282_v14   ;;  %v797_v19 = vadd.f32 %v1369_v17, %v1570_v24  ;;  %v813_v20 = vadd.f32 %v1385_v18, %v1570_v24  ;;  %v586_v21 = vpop.f32.mrb[9].mxu0  ;;  %v650_v22 = vpop.f32.mrb[9].mxu1 }
 0x10c   : > { %1305 = vst [vmem:[%s1585_s17 + $0x10] sm:$0xff] %v1237_v15   ;;  %1313 = vst [vmem:[%s1585_s17 + $0x50] sm:$0xff] %v1277_v16   ;;  %v795_v23 = vadd.f32 %v1570_v24, %v586_v21  ;;  %v811_v25 = vadd.f32 %v1570_v24, %v650_v22  ;;  %v1370_v26 = vpop.f32.mrb[10].mxu0  ;;  %v1386_v27 = vpop.f32.mrb[10].mxu1 }
 0x10d   : > { %v798_v28 = vadd.f32 %v1370_v26, %v1570_v24  ;;  %v814_v29 = vadd.f32 %v1386_v27, %v1570_v24  ;;  %v589_v30 = vpop.f32.mrb[11].mxu0  ;;  %v653_v31 = vpop.f32.mrb[11].mxu1  ;;  %v829_v34 = vmax.f32 %v797_v19, 0.0  ;;  %v845_v35 = vmax.f32 %v813_v20, 0.0 }
 0x10e   : > { %v796_v32 = vadd.f32 %v1570_v24, %v589_v30  ;;  %v812_v33 = vadd.f32 %v1570_v24, %v653_v31  ;;  %v827_v38 = vmax.f32 %v795_v23, 0.0  ;;  %v843_v39 = vmax.f32 %v811_v25, 0.0 }
 0x10f   : > { %v830_v36 = vmax.f32 %v798_v28, 0.0  ;;  %v846_v37 = vmax.f32 %v814_v29, 0.0 }
 0x110   : > { %v828_v40 = vmax.f32 %v796_v32, 0.0  ;;  %v844_v41 = vmax.f32 %v812_v33, 0.0 }
 0x111   : > { %v1252_v42 = vpack.c.bf16 %v830_v36, %v829_v34  ;;  %v1292_v43 = vpack.c.bf16 %v846_v37, %v845_v35 }
 0x112   : > { %v1247_v44 = vpack.c.bf16 %v828_v40, %v827_v38  ;;  %v1287_v45 = vpack.c.bf16 %v844_v41, %v843_v39  ;;  %v1373_v46 = vpop.f32.mrb[12].mxu0  ;;  %v1389_v47 = vpop.f32.mrb[12].mxu1 }
 0x113   : > { %1308 = vst [vmem:[%s1585_s17 + $0x28] sm:$0xff] %v1252_v42   ;;  %1316 = vst [vmem:[%s1585_s17 + $0x68] sm:$0xff] %v1292_v43   ;;  %v801_v48 = vadd.f32 %v1373_v46, %v1570_v24  ;;  %v817_v49 = vadd.f32 %v1389_v47, %v1570_v24  ;;  %v602_v50 = vpop.f32.mrb[13].mxu0  ;;  %v666_v51 = vpop.f32.mrb[13].mxu1 }
 0x114   : > { %1307 = vst [vmem:[%s1585_s17 + $0x20] sm:$0xff] %v1247_v44   ;;  %1315 = vst [vmem:[%s1585_s17 + $0x60] sm:$0xff] %v1287_v45   ;;  %v799_v52 = vadd.f32 %v1570_v24, %v602_v50  ;;  %v815_v53 = vadd.f32 %v1570_v24, %v666_v51  ;;  %v1374_v54 = vpop.f32.mrb[14].mxu0  ;;  %v1390_v55 = vpop.f32.mrb[14].mxu1 }
 0x115   : > { %v802_v56 = vadd.f32 %v1374_v54, %v1570_v24  ;;  %v818_v57 = vadd.f32 %v1390_v55, %v1570_v24  ;;  %v605_v58 = vpop.f32.mrb[15].mxu0  ;;  %v669_v59 = vpop.f32.mrb[15].mxu1  ;;  %v833_v62 = vmax.f32 %v801_v48, 0.0  ;;  %v849_v63 = vmax.f32 %v817_v49, 0.0 }
 0x116   : > { %v800_v60 = vadd.f32 %v1570_v24, %v605_v58  ;;  %v816_v61 = vadd.f32 %v1570_v24, %v669_v59  ;;  %v831_v2 = vmax.f32 %v799_v52, 0.0  ;;  %v847_v3 = vmax.f32 %v815_v53, 0.0 }
 0x117   : > { %v834_v0 = vmax.f32 %v802_v56, 0.0  ;;  %v850_v1 = vmax.f32 %v818_v57, 0.0 }
 0x118   : > { %v832_v4 = vmax.f32 %v800_v60, 0.0  ;;  %v848_v5 = vmax.f32 %v816_v61, 0.0 }
 0x119   : > { %v1262_v6 = vpack.c.bf16 %v834_v0, %v833_v62  ;;  %v1302_v7 = vpack.c.bf16 %v850_v1, %v849_v63 }
 0x11a   : > { %v1257_v8 = vpack.c.bf16 %v832_v4, %v831_v2  ;;  %v1297_v9 = vpack.c.bf16 %v848_v5, %v847_v3 }
 0x11b   : > { %1310 = vst [vmem:[%s1585_s17 + $0x38] sm:$0xff] %v1262_v6   ;;  %1318 = vst [vmem:[%s1585_s17 + $0x78] sm:$0xff] %v1302_v7  }
 0x11c   : > { %1309 = vst [vmem:[%s1585_s17 + $0x30] sm:$0xff] %v1257_v8   ;;  %1317 = vst [vmem:[%s1585_s17 + $0x70] sm:$0xff] %v1297_v9  }
 0x11d PF: > { %s13_s14 = sadd.s32 1, %s1477_s14   ;;  %s1640_s12 = smov %s1473_s13 }
 0x11e   : > { %p10_p5 = scmp.ge.s32.totalorder %s13_s14, 4   ;;  %s1641_s13 = smov %s1643_s15 }
 0x120   :  { %12 = sbr.rel (!%p10_p5) target bundleno = 2 (0x2), region = 76 }

// kernel: vgg_forward.5
= control target key start
LH: loop header
LB: loop body
LE: loop exit
PB: predicated region body
PF: predicated region fallthrough
CT: control target
= control target key end

     0   :  { %s681_s1 = inlined_call_operand.vmem [shape: bf16[512,128], index: 1, kind: input, shape index: {}]   ;;  %s682_s0 = inlined_call_operand.vmem [shape: bf16[16,512], index: 0, kind: input, shape index: {}]   ;;  %s683_s2 = inlined_call_operand.vmem [shape: f32[1,128], index: 2, kind: input, shape index: {}]   ;;  %s684_s3 = inlined_call_operand.vmem [shape: bf16[16,128], index: 3, kind: output, shape index: {}]  }
   0x1   :  { %v509_v0 = vld [vmem:[%s681_s1 + $0x40] sm:$0xff]   ;;  %v513_v4 = vld [vmem:[%s681_s1 + $0x48] sm:$0xff]   ;;  %v517_v8 = vld [vmem:[%s681_s1 + $0x50] sm:$0xff]  }
   0x2   :  { %v510_v1 = vld [vmem:[%s681_s1 + $0xc0] sm:$0xff]   ;;  %465 = vmatprep.subr.bf16.mxu0 %v509_v0  ;;  %v514_v5 = vld [vmem:[%s681_s1 + $0xc8] sm:$0xff]   ;;  %v518_v9 = vld [vmem:[%s681_s1 + $0xd0] sm:$0xff]  }
   0x3   :  { %v511_v2 = vld [vmem:[%s681_s1] sm:$0xff]   ;;  %487 = vmatprep.subr.bf16.mxu1 %v510_v1  ;;  %v515_v6 = vld [vmem:[%s681_s1 + $0x8] sm:$0xff]   ;;  %v519_v10 = vld [vmem:[%s681_s1 + $0x10] sm:$0xff]  }
   0x4   :  { %v512_v3 = vld [vmem:[%s681_s1 + $0x80] sm:$0xff]   ;;  %466 = vmatpush3.bf16.msra.mxu0 %v511_v2  ;;  %v516_v7 = vld [vmem:[%s681_s1 + $0x88] sm:$0xff]   ;;  %v520_v11 = vld [vmem:[%s681_s1 + $0x90] sm:$0xff]  }
   0x5   :  { %488 = vmatpush3.bf16.msra.mxu1 %v512_v3  ;;  %467 = vmatprep.subr.bf16.mxu0 %v513_v4  ;;  %v521_v12 = vld [vmem:[%s681_s1 + $0x58] sm:$0xff]   ;;  %v525_v16 = vld [vmem:[%s681_s1 + $0x60] sm:$0xff]   ;;  %v529_v20 = vld [vmem:[%s681_s1 + $0x68] sm:$0xff]  }
   0x6   :  { %489 = vmatprep.subr.bf16.mxu1 %v514_v5  ;;  %v522_v13 = vld [vmem:[%s681_s1 + $0xd8] sm:$0xff]   ;;  %v526_v17 = vld [vmem:[%s681_s1 + $0xe0] sm:$0xff]   ;;  %v530_v21 = vld [vmem:[%s681_s1 + $0xe8] sm:$0xff]  }
   0x7   :  { %v523_v14 = vld [vmem:[%s681_s1 + $0x18] sm:$0xff]   ;;  %v527_v18 = vld [vmem:[%s681_s1 + $0x20] sm:$0xff]   ;;  %v531_v22 = vld [vmem:[%s681_s1 + $0x28] sm:$0xff]  }
   0x8   :  { %468 = vmatpush3.bf16.msra.mxu0 %v515_v6  ;;  %v524_v15 = vld [vmem:[%s681_s1 + $0x98] sm:$0xff]   ;;  %v528_v19 = vld [vmem:[%s681_s1 + $0xa0] sm:$0xff]   ;;  %v532_v23 = vld [vmem:[%s681_s1 + $0xa8] sm:$0xff]  }
   0x9   :  { %490 = vmatpush3.bf16.msra.mxu1 %v516_v7  ;;  %469 = vmatprep.subr.bf16.mxu0 %v517_v8  ;;  %v533_v24 = vld [vmem:[%s681_s1 + $0x70] sm:$0xff]   ;;  %v537_v28 = vld [vmem:[%s681_s1 + $0x78] sm:$0xff]   ;;  %v455_v45 = vld [vmem:[%s683_s2] ss:$0 sm:$0xff] }
   0xa   :  { %491 = vmatprep.subr.bf16.mxu1 %v518_v9  ;;  %v534_v25 = vld [vmem:[%s681_s1 + $0xf0] sm:$0xff]   ;;  %v538_v29 = vld [vmem:[%s681_s1 + $0xf8] sm:$0xff]  }
   0xb   :  { %v535_v26 = vld [vmem:[%s681_s1 + $0x30] sm:$0xff]   ;;  %v539_v30 = vld [vmem:[%s681_s1 + $0x38] sm:$0xff]  }
   0xc   :  { %470 = vmatpush3.bf16.msra.mxu0 %v519_v10  ;;  %v536_v27 = vld [vmem:[%s681_s1 + $0xb0] sm:$0xff]   ;;  %v540_v31 = vld [vmem:[%s681_s1 + $0xb8] sm:$0xff]  }
   0xd   :  { %492 = vmatpush3.bf16.msra.mxu1 %v520_v11  ;;  %471 = vmatprep.subr.bf16.mxu0 %v521_v12  ;;  %v541_v32 = vld [vmem:[%s682_s0] ss:$16 sps:$4 sm:$0xff]   ;;  %v543_v33 = vld [vmem:[%s682_s0 + $0x4] ss:$16 sps:$4 sm:$0xff]   ;;  %v544_v34 = vld [vmem:[%s682_s0 + $0x8] ss:$16 sps:$4 sm:$0xff]  }
   0xe   :  { %493 = vmatprep.subr.bf16.mxu1 %v522_v13  ;;  %v546_v35 = vld [vmem:[%s682_s0 + $0xc] ss:$16 sps:$4 sm:$0xff]   ;;  %335 = vmatprep.mubr.bf16.mxu0 %v543_v33 }
   0xf   :  { %376 = vmatprep.mubr.bf16.mxu1 %v546_v35 }
  0x10   :  { %472 = vmatpush3.bf16.msra.mxu0 %v523_v14 }
  0x11   :  { %494 = vmatpush3.bf16.msra.mxu1 %v524_v15  ;;  %473 = vmatprep.subr.bf16.mxu0 %v525_v16 }
  0x12   :  { %495 = vmatprep.subr.bf16.mxu1 %v526_v17 }
  0x14   :  { %474 = vmatpush3.bf16.msra.mxu0 %v527_v18 }
  0x15   :  { %496 = vmatpush3.bf16.msra.mxu1 %v528_v19  ;;  %475 = vmatprep.subr.bf16.mxu0 %v529_v20 }
  0x16   :  { %497 = vmatprep.subr.bf16.mxu1 %v530_v21 }
  0x18   :  { %476 = vmatpush3.bf16.msra.mxu0 %v531_v22 }
  0x19   :  { %498 = vmatpush3.bf16.msra.mxu1 %v532_v23  ;;  %477 = vmatprep.subr.bf16.mxu0 %v533_v24 }
  0x1a   :  { %499 = vmatprep.subr.bf16.mxu1 %v534_v25 }
  0x1c   :  { %478 = vmatpush3.bf16.msra.mxu0 %v535_v26 }
  0x1d   :  { %500 = vmatpush3.bf16.msra.mxu1 %v536_v27  ;;  %479 = vmatprep.subr.bf16.mxu0 %v537_v28 }
  0x1e   :  { %501 = vmatprep.subr.bf16.mxu1 %v538_v29 }
  0x20   :  { %480 = vmatpush3.bf16.msra.mxu0 %v539_v30 }
  0x21   :  { %502 = vmatpush3.bf16.msra.mxu1 %v540_v31 }
  0x23   :  { %336 = vmatmul.mubr.bf16.vlgmr.msra.gmra.mrb[0].mxu0 %v541_v32 }
  0x24   :  { %377 = vmatmul.mubr.bf16.vlgmr.msra.gmra.mrb[0].mxu1 %v544_v34 }
  0xf6   :  { %v481_v36 = vpop.f32.mrb[0].mxu0 }
  0xf7   :  { %v503_v37 = vpop.f32.mrb[0].mxu1  ;;  %v482_v38 = vpop.f32.mrb[1].mxu0 }
  0xf8   :  { %v483_v39 = vadd.f32 %v482_v38, %v481_v36  ;;  %v504_v40 = vpop.f32.mrb[1].mxu1  ;;  %v484_v41 = vpop.f32.mrb[2].mxu0 }
  0xf9   :  { %v505_v42 = vadd.f32 %v504_v40, %v503_v37  ;;  %v506_v43 = vpop.f32.mrb[2].mxu1  ;;  %v485_v44 = vpop.f32.mrb[3].mxu0 }
  0xfa   :  { %v486_v46 = vadd.f32 %v485_v44, %v484_v41  ;;  %v507_v47 = vpop.f32.mrb[3].mxu1 }
  0xfb   :  { %v379_v48 = vadd.f32 %v505_v42, %v483_v39  ;;  %v508_v49 = vadd.f32 %v507_v47, %v506_v43 }
  0xfd   :  { %v401_v50 = vadd.f32 %v455_v45, %v379_v48  ;;  %v382_v51 = vadd.f32 %v508_v49, %v486_v46 }
  0xff   :  { %v402_v52 = vadd.f32 %v455_v45, %v382_v51  ;;  %v403_v53 = vmax.f32 %v401_v50, 0.0 }
 0x101   :  { %v404_v54 = vmax.f32 %v402_v52, 0.0 }
 0x103   :  { %v463_v55 = vpack.c.bf16 %v404_v54, %v403_v53 }
 0x105   :  { %464 = vst [vmem:[%s684_s3] sm:$0xff] %v463_v55  }

// kernel: vgg_forward.6
= control target key start
LH: loop header
LB: loop body
LE: loop exit
PB: predicated region body
PF: predicated region fallthrough
CT: control target
= control target key end

     0   :  { %v280_v1 = vmov 0   ;;  %v194_v18 = vlaneseq  ;;  %s377_s1 = inlined_call_operand.vmem [shape: bf16[128,256], index: 1, kind: input, shape index: {}]   ;;  %s378_s0 = inlined_call_operand.vmem [shape: bf16[16,128], index: 0, kind: input, shape index: {}]   ;;  %s379_s3 = inlined_call_operand.vmem [shape: f32[1,256], index: 3, kind: input, shape index: {}]   ;;  %s380_s2 = inlined_call_operand.vmem [shape: f32[1,256], index: 2, kind: input, shape index: {}]   ;;  %s381_s4 = inlined_call_operand.vmem [shape: f32[16,256], index: 4, kind: output, shape index: {}]  }
   0x1   :  { %v255_v0 = vld [vmem:[%s377_s1 + $0x4] ss:$8 sps:$4 sm:$0xff]   ;;  %166 = vmatprep.mubr.bf16.mxu0 %v280_v1  ;;  %v257_v2 = vld [vmem:[%s377_s1] ss:$8 sps:$4 sm:$0xff]   ;;  %v258_v3 = vld [vmem:[%s377_s1 + $0x14] ss:$8 sps:$4 sm:$0xff]  }
   0x2   :  { %134 = vmatprep.subr.bf16.mxu0 %v255_v0  ;;  %v260_v4 = vld [vmem:[%s377_s1 + $0x10] ss:$8 sps:$4 sm:$0xff]   ;;  %v261_v5 = vld [vmem:[%s377_s1 + $0x24] ss:$8 sps:$4 sm:$0xff]   ;;  %v263_v6 = vld [vmem:[%s377_s1 + $0x20] ss:$8 sps:$4 sm:$0xff]  }
   0x3   :  { %135 = vmatpush1.bf16.msra.mxu0 %v257_v2  ;;  %v264_v7 = vld [vmem:[%s377_s1 + $0x34] ss:$8 sps:$4 sm:$0xff]   ;;  %v266_v8 = vld [vmem:[%s377_s1 + $0x30] ss:$8 sps:$4 sm:$0xff]   ;;  %v267_v9 = vld [vmem:[%s377_s1 + $0x44] ss:$8 sps:$4 sm:$0xff]  }
   0x4   :  { %136 = vmatprep.subr.bf16.mxu0 %v258_v3  ;;  %v269_v10 = vld [vmem:[%s377_s1 + $0x40] ss:$8 sps:$4 sm:$0xff]   ;;  %v270_v11 = vld [vmem:[%s377_s1 + $0x54] ss:$8 sps:$4 sm:$0xff]   ;;  %v272_v12 = vld [vmem:[%s377_s1 + $0x50] ss:$8 sps:$4 sm:$0xff]  }
   0x5   :  { %v273_v13 = vld [vmem:[%s377_s1 + $0x64] ss:$8 sps:$4 sm:$0xff]   ;;  %v275_v14 = vld [vmem:[%s377_s1 + $0x60] ss:$8 sps:$4 sm:$0xff]   ;;  %v276_v15 = vld [vmem:[%s377_s1 + $0x74] ss:$8 sps:$4 sm:$0xff]  }
   0x6   :  { %v278_v16 = vld [vmem:[%s377_s1 + $0x70] ss:$8 sps:$4 sm:$0xff]   ;;  %v279_v17 = vld [vmem:[%s378_s0] sm:$0xff]   ;;  %v195_v19 = vshrl.u32 %v194_v18, 7 }
   0x7   :  { %137 = vmatpush1.bf16.msra.mxu0 %v260_v4  ;;  %v208_v20 = vld [vmem:[%s379_s3] sm:$0x3] }
   0x8   :  { %138 = vmatprep.subr.bf16.mxu0 %v261_v5  ;;  %vm209_vm0 = vcmp.gt.f32.partialorder %v208_v20, 0.5  ;;  %v196_v21 = vsub.s32 0, %v195_v19  ;;  %v200_v22 = vsub.s32 1, %v195_v19  ;;  %v192_v23 = vld [vmem:[%s380_s2] sm:$0x3] }
   0x9   :  { %v214_v24 = vsel %vm209_vm0, 1, %v280_v1 }
   0xa   :  { %v197_v25 = vrot.slane %v192_v23, %v196_v21  ;;  %v218_v26 = vrot.slane %v214_v24, %v196_v21  ;;  %v201_v27 = vrot.slane %v192_v23, %v200_v22  ;;  %v222_v28 = vrot.slane %v214_v24, %v200_v22 }
   0xb   :  { %139 = vmatpush1.bf16.msra.mxu0 %v263_v6 }
   0xc   :  { %140 = vmatprep.subr.bf16.mxu0 %v264_v7  ;;  %vm223_vm1 = vcmp.eq.s32.totalorder %v218_v26, 1  ;;  %vm224_vm2 = vcmp.eq.s32.totalorder %v222_v28, 1 }
   0xf   :  { %141 = vmatpush1.bf16.msra.mxu0 %v266_v8 }
  0x10   :  { %142 = vmatprep.subr.bf16.mxu0 %v267_v9 }
  0x13   :  { %143 = vmatpush1.bf16.msra.mxu0 %v269_v10 }
  0x14   :  { %144 = vmatprep.subr.bf16.mxu0 %v270_v11 }
  0x17   :  { %145 = vmatpush1.bf16.msra.mxu0 %v272_v12 }
  0x18   :  { %146 = vmatprep.subr.bf16.mxu0 %v273_v13 }
  0x1b   :  { %147 = vmatpush1.bf16.msra.mxu0 %v275_v14 }
  0x1c   :  { %148 = vmatprep.subr.bf16.mxu0 %v276_v15 }
  0x1f   :  { %149 = vmatpush1.bf16.msra.mxu0 %v278_v16 }
  0x22   :  { %167 = vmatmul.mubr.bf16.vlgmr.msra.gmra.mrb[0].mxu0 %v279_v17 }
  0xf5   :  { %v168_v29 = vpop.f32.mrb[0].mxu0 }
  0xf6   :  { %v204_v30 = vadd.f32 %v197_v25, %v168_v29  ;;  %v170_v31 = vpop.f32.mrb[1].mxu0 }
  0xf7   :  { %v205_v32 = vadd.f32 %v201_v27, %v170_v31  ;;  %v172_v33 = vpop.f32.mrb[2].mxu0 }
  0xf8   :  { %v210_v34 = vmax.f32 %v204_v30, 0.0  ;;  %v206_v35 = vadd.f32 %v197_v25, %v172_v33  ;;  %v174_v36 = vpop.f32.mrb[3].mxu0 }
  0xf9   :  { %v211_v37 = vmax.f32 %v205_v32, 0.0  ;;  %v207_v38 = vadd.f32 %v201_v27, %v174_v36 }
  0xfa   :  { %v225_v39 = vsel %vm223_vm1, %v210_v34, %v204_v30  ;;  %v212_v40 = vmax.f32 %v206_v35, 0.0 }
  0xfb   :  { %229 = vst [vmem:[%s381_s4] sm:$0xff] %v225_v39  ;;  %v226_v41 = vsel %vm224_vm2, %v211_v37, %v205_v32  ;;  %v213_v42 = vmax.f32 %v207_v38, 0.0 }
  0xfc   :  { %230 = vst [vmem:[%s381_s4 + $0x8] sm:$0xff] %v226_v41  ;;  %v227_v43 = vsel %vm223_vm1, %v212_v40, %v206_v35 }
  0xfd   :  { %231 = vst [vmem:[%s381_s4 + $0x10] sm:$0xff] %v227_v43  ;;  %v228_v44 = vsel %vm224_vm2, %v213_v42, %v207_v38 }
  0xfe   :  { %232 = vst [vmem:[%s381_s4 + $0x18] sm:$0xff] %v228_v44 }

// kernel: vgg_forward.7
= control target key start
LH: loop header
LB: loop body
LE: loop exit
PB: predicated region body
PF: predicated region fallthrough
CT: control target
= control target key end

     0   :  { %s893_s18 = smov 0   ;;  %s895_s19 = smov 0   ;;  %s996_s0 = inlined_call_operand.vmem [shape: f32[2,1,128], index: 0, kind: input, shape index: {}]   ;;  %s997_s1 = inlined_call_operand.vmem [shape: f32[2,1,128], index: 1, kind: input, shape index: {}]   ;;  %s998_s2 = inlined_call_operand.vmem [shape: bf16[2,16,128], index: 2, kind: input, shape index: {}]   ;;  %s999_s3 = inlined_call_operand.vmem [shape: bf16[128,128], index: 3, kind: input, shape index: {}]   ;;  %s1000_s4 = inlined_call_operand.vmem [shape: f32[1,128], index: 4, kind: input, shape index: {}]   ;;  %s1001_s5 = inlined_call_operand.vmem [shape: f32[16,256], index: 5, kind: output, shape index: {}]  }
   0x1   :  { %s897_s20 = smov 0   ;;  %s899_s21 = smov 0  }
   0x2   :  { %s901_s22 = smov 0  }
   0x3 LB: > { %s712_s23 = sadd.s32 4294967295, %s859_s22   ;;  %s41_s24 = sadd.s32 1, %s855_s21  ;;  %s859_s22 = sphi %s901_s22, %s15_s22   ;;  %s855_s21 = sphi %s899_s21, %s1006_s21   ;;  %s851_s20 = sphi %s897_s20, %s1005_s20   ;;  %s847_s19 = sphi %s895_s19, %s1004_s19   ;;  %s843_s18 = sphi %s893_s18, %s1003_s18  }
   0x4   : > { %p43_p0 = scmp.ge.s32.totalorder %s41_s24, 2  ;;  %s192_s25 = sadd.s32 1, %s847_s19 }
   0x5   : > { %p202_p1 = scmp.ne.s32.totalorder %s847_s19, %s843_s18  ;;  %p203_p2 = scmp.eq.s32.totalorder %s712_s23, 1 }
   0x6   : > { %s1008_s24 = smov (%p43_p0, %s41_s24), 0  ;;  %p718_p4 = scmp.ge.s32.totalorder %s859_s22, 1 }
   0x7   : > { %p925_p3 = por %p203_p2, %p202_p1  ;;  %s188_s27 = ssub.s32 %s855_s21, %s1008_s24 }
   0x8   : > { %p279_p5 = scmp.lt.s32.totalorder %s859_s22, 3  ;;  %p190_p6 = scmp.eq.s32.totalorder %s188_s27, 0 }
   0xa   : > { %p280_p7 = pnand %p718_p4, %p279_p5 }
   0xb   : > { %s934_s28 = scalar_select %p190_p6, %s847_s19, %s192_s25  }
   0xc   : > { %283 = sbr.rel (%p280_p7) target bundleno = 270 (0x10e), region = 40  ;;  %v813_v0 = vld [vmem:[%s999_s3] sm:$0xff] (!%p280_p7)   ;;  %v861_v1 = vmov (!%p280_p7), 0.0   ;;  %v814_v2 = vld [vmem:[%s999_s3 + $0x8] sm:$0xff] (!%p280_p7)   ;;  %vm862_vm0 = vmmov (!%p280_p7), 0   ;;  %p336_p8 = scmp.lt.s32.totalorder (!%p280_p7), %s851_s20, 1 }
   0xd   : > { %751 = vmatprep.subr.bf16.mxu0 (!%p280_p7), %v861_v1  ;;  %767 = vmatprep.mubr.msk.bf16.mxu0 (!%p280_p7), %vm862_vm0, %v861_v1  ;;  %v815_v3 = vld [vmem:[%s999_s3 + $0x10] sm:$0xff] (!%p280_p7)   ;;  %v816_v4 = vld [vmem:[%s999_s3 + $0x18] sm:$0xff] (!%p280_p7)   ;;  %v817_v5 = vld [vmem:[%s999_s3 + $0x20] sm:$0xff] (!%p280_p7)  }
   0xe   : > { %752 = vmatpush3.bf16.msra.mxu0 (!%p280_p7), %v813_v0  ;;  %v818_v9 = vld [vmem:[%s999_s3 + $0x28] sm:$0xff] (!%p280_p7)   ;;  %v819_v13 = vld [vmem:[%s999_s3 + $0x30] sm:$0xff] (!%p280_p7)   ;;  %v820_v17 = vld [vmem:[%s999_s3 + $0x38] sm:$0xff] (!%p280_p7)  }
   0xf   : > { %753 = vmatprep.subr.bf16.mxu0 (!%p280_p7), %v861_v1  ;;  %v732_v19 = vld [vmem:[%s1000_s4] ss:$0 sm:$0xff] (!%p280_p7) }
  0x12   : > { %754 = vmatpush3.bf16.msra.mxu0 (!%p280_p7), %v814_v2 }
  0x13   : > { %s337_s8 = scalar_select %p336_p8, %s851_s20, 1  ;;  %755 = vmatprep.subr.bf16.mxu0 %v861_v1 }
  0x14   : > { %s734_s25 = sshll.u32 (%p925_p3), %s851_s20, 3 }
  0x15   : > { %s737_s11 = sshll.u32 %s337_s8, 3  ;;  %s347_s29 = scalar_lea.vmem %s997_s1, %s337_s8 }
  0x16   : > { %756 = vmatpush3.bf16.msra.mxu0 %v815_v3  ;;  %s359_s16 = scalar_lea.vmem %s998_s2, %s737_s11  ;;  %v722_v10 = vld [vmem:[%s347_s29] ss:$0 sm:$0xff]  ;;  %s341_s10 = scalar_lea.vmem %s996_s0, %s337_s8 }
  0x17   : > { %757 = vmatprep.subr.bf16.mxu0 %v861_v1  ;;  %v739_v6 = vld [vmem:[%s359_s16] sm:$0xff]   ;;  %s333_s8 = sand.u32 1, %s843_s18   ;;  %s544_s29 = scalar_lea.vmem (%p925_p3), %s1001_s5, %s734_s25 }
  0x18   : > { %v740_v7 = vunpack.c.l.bf16 %v739_v6  ;;  %v741_v8 = vunpack.c.h.bf16 %v739_v6  ;;  %v723_v14 = vld [vmem:[%s341_s10] ss:$0 sm:$0xff]  ;;  %s719_s15 = sshll.u32 %s333_s8, 4 }
  0x19   : > { %s335_s23 = scalar_lea.vmem [#allocation3], %s719_s15 }
  0x1a   : > { %758 = vmatpush3.bf16.msra.mxu0 %v816_v4  ;;  %v394_v11 = vmul.f32 %v740_v7, %v722_v10  ;;  %v395_v12 = vmul.f32 %v741_v8, %v722_v10 }
  0x1b   : > { %759 = vmatprep.subr.bf16.mxu0 %v861_v1 }
  0x1c   : > { %v402_v15 = vadd.f32 %v723_v14, %v394_v11  ;;  %v403_v16 = vadd.f32 %v723_v14, %v395_v12 }
  0x1e   : > { %760 = vmatpush3.bf16.msra.mxu0 %v817_v5  ;;  %v406_v18 = vpack.c.bf16 %v403_v16, %v402_v15 }
  0x1f   : > { %761 = vmatprep.subr.bf16.mxu0 %v861_v1 }
  0x22   : > { %762 = vmatpush3.bf16.msra.mxu0 %v818_v9 }
  0x23   : > { %763 = vmatprep.subr.bf16.mxu0 %v861_v1 }
  0x26   : > { %764 = vmatpush3.bf16.msra.mxu0 %v819_v13 }
  0x27   : > { %765 = vmatprep.subr.bf16.mxu0 %v861_v1 }
  0x2a   : > { %766 = vmatpush3.bf16.msra.mxu0 %v820_v17 }
  0x2d   : > { %768 = vmatmul.mubr.bf16.vlgmr.msra.gmra.mrb[0].mxu0 %v406_v18 }
  0xff   : > { %538 = sbr.rel (!%p925_p3) target bundleno = 270 (0x10e), region = 52 }
 0x100   : > { %v505_v20 = vpop.f32.mrb[0].mxu0 }
 0x101   : > { %v528_v21 = vadd.f32 %v732_v19, %v505_v20  ;;  %v769_v22 = vpop.f32.mrb[1].mxu0 }
 0x102   : > { %v508_v23 = vpop.f32.mrb[2].mxu0 }
 0x103   : > { %530 = vst [vmem:[%s335_s23] sm:$0xff] %v528_v21  ;;  %v529_v24 = vadd.f32 %v732_v19, %v508_v23  ;;  %v770_v25 = vpop.f32.mrb[3].mxu0 }
 0x105   : > { %531 = vst [vmem:[%s335_s23 + $0x8] sm:$0xff] %v529_v24 }
 0x10a   : > { %v574_v26 = vld [vmem:[%s335_s23] sm:$0xff] }
 0x10b   : > { %575 = vst [vmem:[%s544_s29] sm:$0xff] %v574_v26 }
 0x10c   : > { %v576_v27 = vld [vmem:[%s335_s23 + $0x8] sm:$0xff] }
 0x10d   : > { %577 = vst [vmem:[%s544_s29 + $0x10] sm:$0xff] %v576_v27 }
 0x10e PF: > { %s15_s22 = sadd.s32 1, %s859_s22   ;;  %s1003_s18 = smov %s847_s19 }
 0x10f   : > { %p12_p9 = scmp.ge.s32.totalorder %s15_s22, 4   ;;  %s1004_s19 = smov %s934_s28 }
 0x110   : > { %s1005_s20 = smov %s855_s21  ;;  %s1006_s21 = smov %s1008_s24 }
 0x111   :  { %14 = sbr.rel (!%p12_p9) target bundleno = 3 (0x3), region = 128 }

</bundles_post_ra>
